<compile_context>
chip_gen: v7x
topology: tpu7x:2x2x1
jax: 0.10.0
libtpu: 0.0.40
codegen_flags: <defaults>
</compile_context>

<pallas_src>
import functools

import jax
import jax.numpy as jnp
from jax import lax
from jax.experimental import pallas as pl
from jax.experimental.pallas import tpu as pltpu


def _fusion_loss_kernel(a_ref, b_ref, f_ref, m_ref, int_ref, o_ref, *,
                        assume_nonneg_fused=False):
    bt, h, w = f_ref.shape
    r = bt * h

    # Cast to f32 *after* the VMEM load so callers can feed bf16 images and an
    # int8 mask without the wrapper materializing f32 copies in HBM.  All the
    # elementwise / roll work runs on a flattened (bt*h, w) slab — with
    # h % 8 == 0 the reshape is a free, layout-preserving view.
    a = a_ref[...].reshape(r, w).astype(jnp.float32)
    b = b_ref[...].reshape(r, w).astype(jnp.float32)
    f = f_ref[...].reshape(r, w).astype(jnp.float32)
    m = m_ref[...].reshape(r, w)            # int8, already binarized in wrapper
    interior = int_ref[...]                 # (h, w) 0/1 f32, precomputed once

    # ---------------- L_Intensity partial: sum |fused - max(A, B)| ----------
    s1 = jnp.sum(jnp.abs(f - jnp.maximum(a, b)), axis=0, keepdims=True)   # (1, w)

    # ------------- L_Background_Residue partial: sum |ADMD(fused)| ----------
    # TODO(synk): ADMD() is referenced but never defined in loss_vif.py; it is
    # implemented here as relu(min over the 8 neighbours of (center-neighbour))
    # * center with edge-replicate borders (border pixels are then exactly 0).
    # pltpu.roll wraps circularly (and, with the batch dim flattened, also
    # across images in the tile), but wrapped values only ever land on border
    # rows / columns, which the interior multiplier zeroes — so this matches
    # edge-replicate semantics exactly while staying on the XLU slot.
    vm = jnp.maximum(pltpu.roll(f, 1, 0), pltpu.roll(f, r - 1, 0))    # rows i∓1
    c3 = jnp.maximum(f, vm)                                           # vertical 3-max
    hm = jnp.maximum(pltpu.roll(c3, 1, 1), pltpu.roll(c3, w - 1, 1))  # cols j∓1
    max8 = jnp.maximum(hm, vm)                                        # all 8 neighbours
    admd = jnp.maximum(f - max8, 0.0) * f                             # (bt*h, w)
    if not assume_nonneg_fused:
        admd = jnp.abs(admd)
    # Sum over the batch tile first (cheap vreg adds), then apply the hoisted
    # interior multiplier once per (h, w) pixel instead of per image.
    admd_hw = jnp.sum(admd.reshape(bt, h, w), axis=0)                 # (h, w)
    s2 = jnp.sum(admd_hw * interior, axis=0, keepdims=True)           # (1, w)

    # ---------------- L_MaskFusionL1loss partial ----------------------------
    # expected = mask*B + (1-mask)*A  (mask binarized)  ==  where(mask!=0, B, A)
    # TODO(synk): equalhist() / filter_background() are not defined in
    # loss_vif.py and are applied as identity; save_image() I/O is skipped.
    expected = jnp.where(m != 0, b, a)
    s3 = jnp.sum(jnp.abs(f - expected), axis=0, keepdims=True)        # (1, w)

    # Lane-dense partial sums; the final (tiny) reduction and the 10/500/20
    # weighting happen in the wrapper.
    o_ref[0, 0:1, :] = s1
    o_ref[0, 1:2, :] = s2
    o_ref[0, 2:3, :] = s3


def _pick_batch_tile(n, bytes_per_img, target_bytes=4 << 20, min_steps=2):
    """Largest divisor of n whose per-step input slab stays under target_bytes,
    while keeping at least min_steps grid steps (feeds both TCs on v7x)."""
    max_bt = max(1, target_bytes // max(bytes_per_img, 1))
    if n >= min_steps:
        max_bt = min(max_bt, n // min_steps)
    bt = 1
    for d in range(1, n + 1):
        if n % d == 0 and d <= max_bt:
            bt = d
    return bt


def fusion_loss_vif(image_A, image_B, image_fused, image_M, *,
                    assume_nonneg_fused=False):
    """Inputs are NCHW with C == 1. Returns (fusion_loss, loss_l1, loss_BR,
    loss_MF) as float32 scalars, matching fusion_loss_vif.forward."""
    a = image_A[:, 0]
    b = image_B[:, 0]
    f = image_fused[:, 0]
    # The mask is only consumed as (mask != 0): binarize to int8 in HBM so the
    # kernel DMAs 1 byte/pixel instead of 4.
    m = (image_M[:, 0] != 0).astype(jnp.int8)
    n, h, w = f.shape

    # Interior (non-border) 0/1 multiplier — hoisted out of the kernel hot path.
    rows = lax.broadcasted_iota(jnp.int32, (h, w), 0)
    cols = lax.broadcasted_iota(jnp.int32, (h, w), 1)
    interior = ((rows >= 1) & (rows <= h - 2) &
                (cols >= 1) & (cols <= w - 2)).astype(jnp.float32)

    bytes_per_img = h * w * (a.dtype.itemsize + b.dtype.itemsize +
                             f.dtype.itemsize + m.dtype.itemsize)
    bt = _pick_batch_tile(n, bytes_per_img)
    steps = n // bt

    in_tile = bt * bytes_per_img + h * w * 4          # images + interior mask
    out_tile = 3 * w * 4
    vmem_limit = int(min(max(2 * (in_tile + out_tile) + (8 << 20), 16 << 20),
                         64 << 20))

    img_spec = pl.BlockSpec((bt, h, w), lambda i: (i, 0, 0))
    partials = pl.pallas_call(
        functools.partial(_fusion_loss_kernel,
                          assume_nonneg_fused=assume_nonneg_fused),
        grid=(steps,),
        in_specs=[img_spec, img_spec, img_spec, img_spec,
                  pl.BlockSpec((h, w), lambda i: (0, 0))],
        out_specs=pl.BlockSpec((1, 3, w), lambda i: (i, 0, 0)),
        out_shape=jax.ShapeDtypeStruct((steps, 3, w), jnp.float32),
        compiler_params=pltpu.CompilerParams(
            dimension_semantics=("parallel",),
            vmem_limit_bytes=vmem_limit,
        ),
    )(a, b, f, m, interior)

    sums = jnp.sum(partials, axis=(0, 2))              # (3,) per-loss totals
    denom = jnp.float32(n) * jnp.float32(h) * jnp.float32(w)   # N*1*H*W
    loss_l1 = 10.0 * sums[0] / denom
    loss_BR = 500.0 * sums[1] / denom
    loss_MF = 20.0 * sums[2] / denom
    fusion_loss = loss_l1 + loss_BR + loss_MF
    return fusion_loss, loss_l1, loss_BR, loss_MF


def _reference(image_A, image_B, image_fused, image_M):
    """Pure-jnp reference (same assumed ADMD) for a correctness self-check."""
    a = image_A[:, 0].astype(jnp.float32)
    b = image_B[:, 0].astype(jnp.float32)
    f = image_fused[:, 0].astype(jnp.float32)
    m = image_M[:, 0] != 0
    loss_l1 = 10.0 * jnp.mean(jnp.abs(f - jnp.maximum(a, b)))
    H, W = f.shape[1], f.shape[2]
    fp = jnp.pad(f, ((0, 0), (1, 1), (1, 1)), mode="edge")
    neigh = [fp[:, 1 + di:1 + di + H, 1 + dj:1 + dj + W]
             for di in (-1, 0, 1) for dj in (-1, 0, 1)
             if not (di == 0 and dj == 0)]
    max8 = functools.reduce(jnp.maximum, neigh)
    admd = jnp.maximum(f - max8, 0.0) * f
    loss_BR = 500.0 * jnp.mean(jnp.abs(admd))
    expected = jnp.where(m, b, a)
    loss_MF = 20.0 * jnp.mean(jnp.abs(f - expected))
    return loss_l1 + loss_BR + loss_MF, loss_l1, loss_BR, loss_MF


if __name__ == "__main__":
    key = jax.random.PRNGKey(0)
    kA, kB, kF, kM = jax.random.split(key, 4)

    # Lane-dense small example: W multiple of 128, H multiple of 8.
    N, C, H, W = 2, 1, 16, 128
    image_A = jax.random.uniform(kA, (N, C, H, W), dtype=jnp.float32)
    image_B = jax.random.uniform(kB, (N, C, H, W), dtype=jnp.float32)
    image_fused = jax.random.uniform(kF, (N, C, H, W), dtype=jnp.float32)
    # binary-ish mask (the module binarizes it anyway)
    image_M = (jax.random.uniform(kM, (N, C, H, W)) > 0.5).astype(jnp.float32)

    out = jax.block_until_ready(
        fusion_loss_vif(image_A, image_B, image_fused, image_M))
    ref = jax.block_until_ready(
        _reference(image_A, image_B, image_fused, image_M))

    fusion_loss, loss_l1, loss_BR, loss_MF = out
    assert all(bool(jnp.isfinite(x)) for x in out)
    for got, want in zip(out, ref):
        assert jnp.allclose(got, want, rtol=1e-4, atol=1e-5), (got, want)
    print("KERNEL_OK")
</pallas_src>

<mosaic_0001>
module attributes {stable_mosaic.version = 11 : i64} {
  func.func @_fusion_loss_kernel(%arg0: i32, %arg1: memref<1x16x128xf32, #tpu.memory_space<vmem>>, %arg2: memref<1x16x128xf32, #tpu.memory_space<vmem>>, %arg3: memref<1x16x128xf32, #tpu.memory_space<vmem>>, %arg4: memref<1x16x128xi8, #tpu.memory_space<vmem>>, %arg5: memref<16x128xf32, #tpu.memory_space<vmem>>, %arg6: memref<1x3x128xf32, #tpu.memory_space<vmem>>) attributes {dimension_semantics = [#tpu.dimension_semantics<parallel>], iteration_bounds = array<i64: 2>, scalar_prefetch = 0 : i64, scratch_operands = 0 : i64, tpu.core_type = #tpu.core_type<tc>, window_params = [{transform_indices = @transform_0, window_bounds = array<i64: 1, 16, 128>}, {transform_indices = @transform_1, window_bounds = array<i64: 1, 16, 128>}, {transform_indices = @transform_2, window_bounds = array<i64: 1, 16, 128>}, {transform_indices = @transform_3, window_bounds = array<i64: 1, 16, 128>}, {pipeline_mode = #tpu.pipeline_mode<synchronous>, transform_indices = @transform_4, window_bounds = array<i64: 16, 128>}, {transform_indices = @transform_5, window_bounds = array<i64: 1, 3, 128>}]} {
    %c0 = arith.constant 0 : index
    %c0_0 = arith.constant 0 : index
    %c0_1 = arith.constant 0 : index
    %0 = vector.load %arg1[%c0, %c0_0, %c0_1] : memref<1x16x128xf32, #tpu.memory_space<vmem>>, vector<1x16x128xf32>
    %1 = vector.shape_cast %0 : vector<1x16x128xf32> to vector<16x128xf32>
    %c0_2 = arith.constant 0 : index
    %c0_3 = arith.constant 0 : index
    %c0_4 = arith.constant 0 : index
    %2 = vector.load %arg2[%c0_2, %c0_3, %c0_4] : memref<1x16x128xf32, #tpu.memory_space<vmem>>, vector<1x16x128xf32>
    %3 = vector.shape_cast %2 : vector<1x16x128xf32> to vector<16x128xf32>
    %c0_5 = arith.constant 0 : index
    %c0_6 = arith.constant 0 : index
    %c0_7 = arith.constant 0 : index
    %4 = vector.load %arg3[%c0_5, %c0_6, %c0_7] : memref<1x16x128xf32, #tpu.memory_space<vmem>>, vector<1x16x128xf32>
    %5 = vector.shape_cast %4 : vector<1x16x128xf32> to vector<16x128xf32>
    %c0_8 = arith.constant 0 : index
    %c0_9 = arith.constant 0 : index
    %c0_10 = arith.constant 0 : index
    %6 = vector.load %arg4[%c0_8, %c0_9, %c0_10] : memref<1x16x128xi8, #tpu.memory_space<vmem>>, vector<1x16x128xi8>
    %7 = vector.shape_cast %6 : vector<1x16x128xi8> to vector<16x128xi8>
    %c0_11 = arith.constant 0 : index
    %c0_12 = arith.constant 0 : index
    %8 = vector.load %arg5[%c0_11, %c0_12] : memref<16x128xf32, #tpu.memory_space<vmem>>, vector<16x128xf32>
    %9 = arith.maximumf %1, %3 : vector<16x128xf32>
    %10 = arith.subf %5, %9 : vector<16x128xf32>
    %11 = math.absf %10 : vector<16x128xf32>
    %cst = arith.constant dense<0.000000e+00> : vector<128xf32>
    %12 = vector.multi_reduction <add>, %11, %cst [0] : vector<16x128xf32> to vector<128xf32>
    %13 = vector.shape_cast %12 : vector<128xf32> to vector<1x128xf32>
    %c1_i32 = arith.constant 1 : i32
    %14 = tpu.dynamic_rotate %5 by %c1_i32 dim 0 : vector<16x128xf32>, i32 -> vector<16x128xf32>
    %c15_i32 = arith.constant 15 : i32
    %15 = tpu.dynamic_rotate %5 by %c15_i32 dim 0 : vector<16x128xf32>, i32 -> vector<16x128xf32>
    %16 = arith.maximumf %14, %15 : vector<16x128xf32>
    %17 = arith.maximumf %5, %16 : vector<16x128xf32>
    %c1_i32_13 = arith.constant 1 : i32
    %18 = tpu.dynamic_rotate %17 by %c1_i32_13 dim 1 : vector<16x128xf32>, i32 -> vector<16x128xf32>
    %c127_i32 = arith.constant 127 : i32
    %19 = tpu.dynamic_rotate %17 by %c127_i32 dim 1 : vector<16x128xf32>, i32 -> vector<16x128xf32>
    %20 = arith.maximumf %18, %19 : vector<16x128xf32>
    %21 = arith.maximumf %20, %16 : vector<16x128xf32>
    %22 = arith.subf %5, %21 : vector<16x128xf32>
    %cst_14 = arith.constant 0.000000e+00 : f32
    %23 = vector.broadcast %cst_14 : f32 to vector<16x128xf32>
    %24 = arith.maximumf %22, %23 : vector<16x128xf32>
    %25 = arith.mulf %24, %5 : vector<16x128xf32>
    %26 = math.absf %25 : vector<16x128xf32>
    %27 = vector.shape_cast %26 : vector<16x128xf32> to vector<1x16x128xf32>
    %cst_15 = arith.constant dense<0.000000e+00> : vector<16x128xf32>
    %28 = vector.multi_reduction <add>, %27, %cst_15 [0] : vector<1x16x128xf32> to vector<16x128xf32>
    %29 = arith.mulf %28, %8 : vector<16x128xf32>
    %cst_16 = arith.constant dense<0.000000e+00> : vector<128xf32>
    %30 = vector.multi_reduction <add>, %29, %cst_16 [0] : vector<16x128xf32> to vector<128xf32>
    %31 = vector.shape_cast %30 : vector<128xf32> to vector<1x128xf32>
    %c0_i8 = arith.constant 0 : i8
    %32 = vector.broadcast %c0_i8 : i8 to vector<16x128xi8>
    %33 = arith.cmpi ne, %7, %32 : vector<16x128xi8>
    %34 = arith.select %33, %3, %1 : vector<16x128xi1>, vector<16x128xf32>
    %35 = arith.subf %5, %34 : vector<16x128xf32>
    %36 = math.absf %35 : vector<16x128xf32>
    %cst_17 = arith.constant dense<0.000000e+00> : vector<128xf32>
    %37 = vector.multi_reduction <add>, %36, %cst_17 [0] : vector<16x128xf32> to vector<128xf32>
    %38 = vector.shape_cast %37 : vector<128xf32> to vector<1x128xf32>
    %c0_18 = arith.constant 0 : index
    %c0_19 = arith.constant 0 : index
    %c0_20 = arith.constant 0 : index
    %39 = vector.load %arg6[%c0_18, %c0_19, %c0_20] : memref<1x3x128xf32, #tpu.memory_space<vmem>>, vector<1x1x128xf32>
    %40 = vector.shape_cast %39 : vector<1x1x128xf32> to vector<1x128xf32>
    %41 = vector.shape_cast %13 : vector<1x128xf32> to vector<1x1x128xf32>
    tpu.vector_store %arg6[%c0_18, %c0_19, %c0_20], %41 {strides = array<i32>} : memref<1x3x128xf32, #tpu.memory_space<vmem>>, vector<1x1x128xf32>,
    %c0_21 = arith.constant 0 : index
    %c1 = arith.constant 1 : index
    %c0_22 = arith.constant 0 : index
    %42 = vector.load %arg6[%c0_21, %c1, %c0_22] : memref<1x3x128xf32, #tpu.memory_space<vmem>>, vector<1x1x128xf32>
    %43 = vector.shape_cast %42 : vector<1x1x128xf32> to vector<1x128xf32>
    %44 = vector.shape_cast %31 : vector<1x128xf32> to vector<1x1x128xf32>
    tpu.vector_store %arg6[%c0_21, %c1, %c0_22], %44 {strides = array<i32>} : memref<1x3x128xf32, #tpu.memory_space<vmem>>, vector<1x1x128xf32>,
    %c0_23 = arith.constant 0 : index
    %c2 = arith.constant 2 : index
    %c0_24 = arith.constant 0 : index
    %45 = vector.load %arg6[%c0_23, %c2, %c0_24] : memref<1x3x128xf32, #tpu.memory_space<vmem>>, vector<1x1x128xf32>
    %46 = vector.shape_cast %45 : vector<1x1x128xf32> to vector<1x128xf32>
    %47 = vector.shape_cast %38 : vector<1x128xf32> to vector<1x1x128xf32>
    tpu.vector_store %arg6[%c0_23, %c2, %c0_24], %47 {strides = array<i32>} : memref<1x3x128xf32, #tpu.memory_space<vmem>>, vector<1x1x128xf32>,
    return
  }
  func.func @transform_0(%arg0: i32) -> (i32, i32, i32) {
    %c0_i32 = arith.constant 0 : i32
    %c0_i32_0 = arith.constant 0 : i32
    %c0_i32_1 = arith.constant 0 : i32
    return %arg0, %c0_i32, %c0_i32_0 : i32, i32, i32
  }
  func.func @transform_1(%arg0: i32) -> (i32, i32, i32) {
    %c0_i32 = arith.constant 0 : i32
    %c0_i32_0 = arith.constant 0 : i32
    %c0_i32_1 = arith.constant 0 : i32
    return %arg0, %c0_i32, %c0_i32_0 : i32, i32, i32
  }
  func.func @transform_2(%arg0: i32) -> (i32, i32, i32) {
    %c0_i32 = arith.constant 0 : i32
    %c0_i32_0 = arith.constant 0 : i32
    %c0_i32_1 = arith.constant 0 : i32
    return %arg0, %c0_i32, %c0_i32_0 : i32, i32, i32
  }
  func.func @transform_3(%arg0: i32) -> (i32, i32, i32) {
    %c0_i32 = arith.constant 0 : i32
    %c0_i32_0 = arith.constant 0 : i32
    %c0_i32_1 = arith.constant 0 : i32
    return %arg0, %c0_i32, %c0_i32_0 : i32, i32, i32
  }
  func.func @transform_4(%arg0: i32) -> (i32, i32) {
    %c0_i32 = arith.constant 0 : i32
    %c0_i32_0 = arith.constant 0 : i32
    %c0_i32_1 = arith.constant 0 : i32
    return %c0_i32, %c0_i32_0 : i32, i32
  }
  func.func @transform_5(%arg0: i32) -> (i32, i32, i32) {
    %c0_i32 = arith.constant 0 : i32
    %c0_i32_0 = arith.constant 0 : i32
    %c0_i32_1 = arith.constant 0 : i32
    return %arg0, %c0_i32, %c0_i32_0 : i32, i32, i32
  }
}

</mosaic_0001>

<bundles_post_ra>
// kernel: tpu_custom_call.1
= control target key start
LH: loop header
LB: loop body
LE: loop exit
PB: predicated region body
PF: predicated region fallthrough
CT: control target
= control target key end

     0   :  { %s1162_s0 = inlined_call_operand.hbm [shape: f32[2,16,128], index: 0, kind: input, shape index: {}]   ;;  %s1163_s1 = inlined_call_operand.hbm [shape: f32[2,16,128], index: 1, kind: input, shape index: {}]   ;;  %s1164_s2 = inlined_call_operand.hbm [shape: f32[2,16,128], index: 2, kind: input, shape index: {}]   ;;  %s1165_s3 = inlined_call_operand.vmem [shape: s8[2,16,128], index: 3, kind: input, shape index: {}]   ;;  %s1166_s4 = inlined_call_operand.hbm [shape: f32[16,128], index: 4, kind: input, shape index: {}]   ;;  %s1167_s5 = inlined_call_operand.vmem [shape: f32[2,3,128], index: 5, kind: output, shape index: {}]  }
   0x1   :  { %1177 = sst [smem:[#allocation12_spill]] %s1162_s0 }
   0x2   :  { %10 = vsyncpa [#allocation3], 0 }
   0x3   :  { %12 = vsyncpa [#allocation3 + $0x1], 0 }
   0x4   :  { %13 = vsyncpa [#allocation5], 0 }
   0x5   :  { %15 = vsyncpa [#allocation5 + $0x1], 0 }
   0x6   :  { %16 = vsyncpa [#allocation8], 0  ;;  %s874_s18 = smov 0   ;;  %s876_s19 = smov 0  }
   0x7   :  { %s878_s20 = smov 0   ;;  %s880_s21 = smov 0  }
   0x8 LB: > { %s895_s22 = sadd.s32 1, %s833_s21   ;;  %s29_s23 = sadd.s32 1, %s829_s20  ;;  %s833_s21 = sphi %s880_s21, %s1195_s21   ;;  %s829_s20 = sphi %s878_s20, %s1194_s20   ;;  %s825_s19 = sphi %s876_s19, %s1193_s19   ;;  %s821_s18 = sphi %s874_s18, %s1192_s18  }
   0x9   : > { %s26_s24 = ssub.s32 %s833_s21, %s895_s22  ;;  %p36_p0 = scmp.ne.s32.totalorder %s829_s20, %s825_s19 }
   0xa   : > { %p27_p1 = scmp.eq.s32.totalorder %s26_s24, 0  ;;  %p37_p2 = scmp.eq.s32.totalorder %s833_s21, 0 }
   0xb   : > { %p633_p4 = scmp.lt.s32.totalorder %s833_s21, 2  ;;  %s204_s26 = sand.u32 1, %s829_s20  }
   0xc   : > { %s904_s25 = scalar_select %p27_p1, %s829_s20, %s29_s23  }
   0xd   : > { %p38_p3 = por %p37_p2, %p36_p0  ;;  %s910_s27 = sshll.u32 %s204_s26, 4 }
   0xe   : > { %s913_s28 = sshll.u32 %s833_s21, 8  ;;  %s225_s30 = sand.u32 1, %s833_s21  }
   0xf   : > { %p915_p5 = pnand %p633_p4, %p38_p3  ;;  %s924_s8 = scalar_lea.hbm %s1163_s1, %s913_s28 }
  0x10   : > { %s229_s9 = scalar_lea.vmem [#allocation4], %s910_s27  ;;  %s929_s11 = scalar_lea.sflag [#allocation5], %s225_s30 }
  0x11   : > { %s1178_s29 = scalar_select %p915_p5, 1, 0 }
  0x12   : > { %s236_s10 = sshll.u32 %s229_s9, 4  ;;  %s673_s12 = scalar_lea.hbm %s924_s8, 256  ;;  %s927_s10 = int_to_ptr.vmem [resolvable:$true] %s236_s10 }
  0x13   : > { %p674_p6 = scmp.ne.s32.totalorder %s924_s8, %s673_s12  ;;  %p935_p7 = pneg %p915_p5 }
  0x14   : > { %s678_s16 = scalar_lea.hbm %s1163_s1, 512  ;;  %p679_p10 = scmp.lt.u32.totalorder %s924_s8, %s1163_s1 }
  0x15   : > { %s1179_s13 = scalar_select %p935_p7, 1, 0 }
  0x16   : > { %p676_p8 = pnand %p935_p7, %p674_p6  ;;  %p680_p11 = scmp.lt.u32.totalorder %s678_s16, %s673_s12 }
  0x17   : > { %p682_p13 = scmp.lt.u32.totalorder %s673_s12, %s924_s8 }
  0x18   : > { %p677_p9 = pneg %p676_p8  ;;  %p681_p12 = por %p680_p11, %p679_p10 }
  0x1a   : > { %p683_p0 = por %p682_p13, %p681_p12 }
  0x1c   : > { %p684_p1 = pnand %p683_p0, %p677_p9 }
  0x1e   : > { %687 = shalt.err (!%p684_p1)
}
  0x1f   : > { %s688_s24 = scalar_lea.vmem %s927_s10, 256  ;;  %s835_s30 = smov [#allocation4]  }
  0x20   : > { %p689_p2 = scmp.ne.s32.totalorder %s927_s10, %s688_s24  ;;  %s693_s6 = sshll.u32 %s835_s30, 4  ;;  %s694_s6 = int_to_ptr.vmem [resolvable:$false] %s693_s6 }
  0x21   : > { %s695_s7 = scalar_lea.vmem %s694_s6, 512  ;;  %p696_p6 = scmp.lt.s32.totalorder %s927_s10, %s694_s6 }
  0x22   : > { %p691_p3 = pnand %p689_p2, %p935_p7  ;;  %p697_p8 = scmp.lt.s32.totalorder %s695_s7, %s688_s24 }
  0x24   : > { %p692_p4 = pneg %p691_p3  ;;  %p698_p10 = por %p697_p8, %p696_p6 }
  0x26   : > { %p699_p11 = pnand %p698_p10, %p692_p4 }
  0x28   : > { %702 = shalt.err (!%p699_p11)
}
  0x29   : > { %s1168_s9 = smov 128   ;;  %s837_s12 = smov 8  }
  0x2a   : > { %628 = dma.hbm_to_vmem [thread:$0]  (!%p915_p5), %s924_s8, 256, %s927_s10, %s929_s11, %s1168_s9, %s1168_s9, %s837_s12  }
  0x2b   : > { %s963_s14 = sadd.s32 4294967295, %s833_s21   ;;  %p42_p9 = scmp.ne.s32.totalorder %s825_s19, %s821_s18 }
  0x2c   : > { %p1170_p12 = scmp.eq.s32.totalorder %s963_s14, 0  ;;  %p582_p13 = scmp.ge.s32.totalorder %s833_s21, 1 }
  0x2d   : > { %p178_p0 = scmp.lt.s32.totalorder %s833_s21, 3  ;;  %s838_s8 = smov [#allocation7]  }
  0x2e   : > { %p972_p1 = por %p1170_p12, %p42_p9  ;;  %s190_s10 = sshll.u32 %s838_s8, 4  ;;  %s980_s10 = int_to_ptr.vmem [resolvable:$true] %s190_s10 }
  0x2f   : > { %p976_p2 = pnand %p582_p13, %p178_p0  ;;  %s1182_s0 = sld [smem:[#allocation12_spill]] }
  0x30   : > { %s1180_s15 = scalar_select %p972_p1, 1, 0 }
  0x31   : > { %s1181_s16 = scalar_select %p976_p2, 1, 0 }
  0x32   : > { %p618_p3 = pneg %p976_p2  ;;  %s208_s23 = scalar_lea.vmem [#allocation2], %s910_s27 }
  0x33   : > { %s215_s24 = sshll.u32 %s208_s23, 4  ;;  %s1001_s6 = scalar_lea.sflag [#allocation3], %s204_s26  ;;  %s997_s24 = int_to_ptr.vmem [resolvable:$true] %s215_s24 }
  0x34   : > { %p993_p4 = pnand %p618_p3, %p1170_p12 }
  0x35   : > { %s988_s21 = scalar_lea.hbm %s1182_s0, %s913_s28  ;;  %s708_s17 = scalar_lea.hbm %s1182_s0, 512 }
  0x36   : > { %s1183_s30 = scalar_select %p993_p4, 1, 0 }
  0x37   : > { %s703_s7 = scalar_lea.hbm %s988_s21, 256  ;;  %p709_p11 = scmp.lt.u32.totalorder %s988_s21, %s1182_s0 }
  0x38   : > { %p704_p6 = scmp.ne.s32.totalorder %s988_s21, %s703_s7  ;;  %p710_p9 = scmp.lt.u32.totalorder %s708_s17, %s703_s7 }
  0x39   : > { %p712_p0 = scmp.lt.u32.totalorder %s703_s7, %s988_s21 }
  0x3a   : > { %p706_p8 = pnand %p704_p6, %p935_p7  ;;  %p711_p13 = por %p710_p9, %p709_p11 }
  0x3c   : > { %p707_p10 = pneg %p706_p8  ;;  %p713_p3 = por %p712_p0, %p711_p13 }
  0x3e   : > { %p714_p12 = pnand %p713_p3, %p707_p10 }
  0x40   : > { %717 = shalt.err (!%p714_p12)
}
  0x41   : > { %s718_s26 = scalar_lea.vmem %s997_s24, 256  ;;  %s839_s8 = smov [#allocation2]  }
  0x42   : > { %p719_p6 = scmp.ne.s32.totalorder %s997_s24, %s718_s26  ;;  %s723_s18 = sshll.u32 %s839_s8, 4  ;;  %s724_s18 = int_to_ptr.vmem [resolvable:$false] %s723_s18 }
  0x43   : > { %s725_s9 = scalar_lea.vmem %s724_s18, 512  ;;  %p726_p2 = scmp.lt.s32.totalorder %s997_s24, %s724_s18 }
  0x44   : > { %p721_p8 = pnand %p719_p6, %p935_p7  ;;  %p727_p4 = scmp.lt.s32.totalorder %s725_s9, %s718_s26 }
  0x46   : > { %p722_p1 = pneg %p721_p8  ;;  %p728_p11 = por %p727_p4, %p726_p2 }
  0x48   : > { %p729_p9 = pnand %p728_p11, %p722_p1 }
  0x4a   : > { %732 = shalt.err (!%p729_p9)
}
  0x4b   : > { %s1184_s7 = smov 128   ;;  %s733_s8 = scalar_lea.hbm %s1166_s4, 256 }
  0x4c   : > { %625 = dma.hbm_to_vmem [thread:$0]  (!%p915_p5), %s988_s21, 256, %s997_s24, %s1001_s6, %s1184_s7, %s1184_s7, %s837_s12  }
  0x4d   : > { %p734_p12 = scmp.ne.s32.totalorder %s1166_s4, %s733_s8  ;;  %p1185_p1 = scmp.ne.s32.totalorder %s1183_s30, 0 }
  0x4e   : > { %p740_p13 = scmp.lt.u32.totalorder %s733_s8, %s1166_s4 }
  0x4f   : > { %p735_p2 = pneg %p1185_p1 }
  0x51   : > { %p736_p4 = pnand %p735_p2, %p734_p12 }
  0x53   : > { %p737_p10 = pneg %p736_p4 }
  0x55   : > { %p742_p0 = pnand %p740_p13, %p737_p10 }
  0x57   : > { %745 = shalt.err (!%p742_p0)
}
  0x58   : > { %s746_s21 = scalar_lea.vmem %s980_s10, 256  ;;  %p754_p11 = scmp.lt.s32.totalorder %s980_s10, %s980_s10 }
  0x59   : > { %p747_p3 = scmp.ne.s32.totalorder %s980_s10, %s746_s21  ;;  %p755_p9 = scmp.lt.s32.totalorder %s746_s21, %s746_s21 }
  0x5b   : > { %p749_p6 = pnand %p747_p3, %p735_p2  ;;  %p756_p5 = por %p755_p9, %p754_p11 }
  0x5d   : > { %p750_p8 = pneg %p749_p6 }
  0x5f   : > { %p757_p7 = pnand %p756_p5, %p750_p8 }
  0x61   : > { %760 = shalt.err (!%p757_p7)
}
  0x62   : > { %621 = dma.hbm_to_vmem [thread:$0]  (!%p1185_p1), %s1166_s4, 256, %s980_s10, [#allocation8], %s1184_s7, %s1184_s7, %s837_s12  }
  0x63   : > { %s1056_s23 = scalar_lea.hbm %s1164_s2, %s913_s28  ;;  %s250_s30 = scalar_lea.vmem [#allocation6], %s910_s27 }
  0x64   : > { %s257_s8 = sshll.u32 %s250_s30, 4  ;;  %s761_s18 = scalar_lea.hbm %s1056_s23, 256  ;;  %s1059_s8 = int_to_ptr.vmem [resolvable:$true] %s257_s8 }
  0x65   : > { %p762_p5 = scmp.ne.s32.totalorder %s1056_s23, %s761_s18  ;;  %p1186_p7 = scmp.ne.s32.totalorder %s1179_s13, 0 }
  0x66   : > { %s766_s9 = scalar_lea.hbm %s1164_s2, 512  ;;  %p767_p1 = scmp.lt.u32.totalorder %s1056_s23, %s1164_s2 }
  0x67   : > { %p764_p12 = pnand %p762_p5, %p1186_p7  ;;  %p768_p4 = scmp.lt.u32.totalorder %s766_s9, %s761_s18 }
  0x68   : > { %p770_p13 = scmp.lt.u32.totalorder %s761_s18, %s1056_s23 }
  0x69   : > { %p765_p2 = pneg %p764_p12  ;;  %p769_p10 = por %p768_p4, %p767_p1 }
  0x6b   : > { %p771_p0 = por %p770_p13, %p769_p10 }
  0x6d   : > { %p772_p3 = pnand %p771_p0, %p765_p2 }
  0x6f   : > { %775 = shalt.err (!%p772_p3)
}
  0x70   : > { %s776_s27 = scalar_lea.vmem %s1059_s8, 256  ;;  %s840_s0 = smov [#allocation6]  }
  0x71   : > { %p777_p6 = scmp.ne.s32.totalorder %s1059_s8, %s776_s27  ;;  %s781_s24 = sshll.u32 %s840_s0, 4  ;;  %s782_s24 = int_to_ptr.vmem [resolvable:$false] %s781_s24 }
  0x72   : > { %s783_s6 = scalar_lea.vmem %s782_s24, 512  ;;  %p784_p9 = scmp.lt.s32.totalorder %s1059_s8, %s782_s24 }
  0x73   : > { %p779_p8 = pnand %p777_p6, %p1186_p7  ;;  %p785_p5 = scmp.lt.s32.totalorder %s783_s6, %s776_s27 }
  0x75   : > { %p780_p11 = pneg %p779_p8  ;;  %p786_p12 = por %p785_p5, %p784_p9 }
  0x77   : > { %p787_p1 = pnand %p786_p12, %p780_p11 }
  0x79   : > { %790 = shalt.err (!%p787_p1)
}
  0x7a   : > { %p1187_p2 = scmp.ne.s32.totalorder %s1178_s29, 0  ;;  %p1188_p7 = scmp.ne.s32.totalorder %s1181_s16, 0 }
  0x7b   : > { %s279_s13 = sand.u32 (!%p1188_p7), 1, %s825_s19   ;;  %p1189_p4 = scmp.ne.s32.totalorder (!%p1188_p7), %s1180_s15, 0 }
  0x7c   : > { %631 = dma.hbm_to_vmem [thread:$0]  (!%p1187_p2), %s1056_s23, 256, %s1059_s8, %s929_s11, %s1184_s7, %s1184_s7, %s837_s12  }
  0x7d   : > { %277 = sbr.rel (%p1188_p7) target bundleno = 297 (0x129), region = 40  ;;  %s1089_s17 = sshll.u32 (!%p1188_p7), %s279_s13, 4 }
  0x7e   : > { %s280_s30 = scalar_lea.sflag (!%p1188_p7), [#allocation3], %s279_s13  ;;  %s283_s18 = scalar_lea.vmem (!%p1188_p7), [#allocation2], %s1089_s17 }
  0x84   : > { %808 = dma.done.wait (%p1189_p4), %s280_s30, 256  }
  0x85   : > { %810 = vsyncadd (%p1189_p4), %s280_s30, 4294967040  ;;  %s288_s29 = sand.u32 1, %s963_s14   ;;  %s292_s12 = scalar_lea.vmem [#allocation4], %s1089_s17 }
  0x86   : > { %s289_s11 = scalar_lea.sflag [#allocation5], %s288_s29 }
  0x87   : > { %812 = dma.done.wait (%p1189_p4), %s289_s11, 512  }
  0x88   : > { %814 = vsyncadd (%p1189_p4), %s289_s11, 4294966784  ;;  %s301_s16 = scalar_lea.vmem [#allocation6], %s1089_s17  ;;  %p1190_p10 = scmp.eq.s32.totalorder %s963_s14, 0 }
  0x8a   : > { %816 = dma.done.wait (%p1190_p10), [#allocation8], 256   ;;  %p1191_p13 = pmov %p1190_p10 }
  0x8b   : > { %v382_v0 = vlaneseq  ;;  %p346_p0 = scmp.lt.s32.totalorder %s963_s14, 1  ;;  %v1111_v2 = vld [vmem:[%s301_s16] sm:$0xff]  ;;  %v1113_v3 = vld [vmem:[%s301_s16 + $0x8] sm:$0xff]  ;;  %v841_v26 = vmov 0   ;;  %s842_s26 = smov 127  }
  0x8c   : > { %818 = vsyncadd (%p1191_p13), [#allocation8], 4294967040  ;;  %v357_v4 = vld [vmem:[%s283_s18] sm:$0xff]  ;;  %v380_v5 = vrot.slane %v1111_v2, 7  ;;  %v381_v6 = vrot.slane %v1113_v3, 7  ;;  %v387_v7 = vrot.slane %v1111_v2, 1 }
  0x8d   : > { %v383_v1 = vshrl.u32 %v382_v0, 7  ;;  %s1197_s14 = smov (!%p346_p0, %s963_s14), 1  ;;  %v388_v8 = vrot.slane %v1113_v3, 1  ;;  %v358_v9 = vld [vmem:[%s283_s18 + $0x8] sm:$0xff]  ;;  %v359_v10 = vld [vmem:[%s292_s12] sm:$0xff]  ;;  %s843_s10 = smov 1  }
  0x8e   : > { %s607_s15 = sshll.u32 %s1197_s14, 2  ;;  %v360_v11 = vld [vmem:[%s292_s12 + $0x8] sm:$0xff]  ;;  %v367_v12 = vmax.f32 %v357_v4, %v359_v10 }
  0x8f   : > { %vm384_vm0 = vcmp.lt.s32.totalorder %v383_v1, 1  ;;  %vm389_vm1 = vcmp.lt.s32.totalorder %v383_v1, 7  ;;  %s350_s8 = scalar_lea.vmem %s1165_s3, %s607_s15  ;;  %v368_v16 = vmax.f32 %v358_v9, %v360_v11  ;;  %s1140_s28 = scalar_lea.vmem %s1167_s5, %s607_s15 }
  0x90   : > { %v363_v13 = vld [vmem:[%s350_s8] sm:$0x3]  ;;  %v386_v14 = vsel %vm384_vm0, %v381_v6, %v380_v5  ;;  %v390_v15 = vsel %vm389_vm1, %v387_v7, %v388_v8  ;;  %v385_v17 = vsel %vm384_vm0, %v380_v5, %v381_v6  ;;  %v364_v18 = vld [vmem:[%s350_s8 + $0x2] sm:$0x3]  ;;  %v369_v20 = vsub.f32 %v1111_v2, %v367_v12 }
  0x91   : > { %v392_v19 = vmax.f32 %v386_v14, %v390_v15  ;;  %v391_v21 = vsel %vm389_vm1, %v388_v8, %v387_v7  ;;  %vm427_vm2 = vnez %v363_v13  ;;  %v370_v22 = vsub.f32 %v1113_v3, %v368_v16  ;;  %v365_v6 = vld [vmem:[#allocation7] sm:$0xff]  ;;  %v366_v7 = vld [vmem:[#allocation7 + $0x8] sm:$0xff] }
  0x92   : > { %v393_v23 = vmax.f32 %v385_v17, %v391_v21  ;;  %vm428_vm3 = vnez %v364_v18  ;;  %v371_v25 = vand.u32 2147483647, %v369_v20  ;;  %v429_v27 = vsel %vm427_vm2, 16843009, %v841_v26 }
  0x93   : > { %v394_v24 = vmax.f32 %v1111_v2, %v392_v19  ;;  %v430_v28 = vsel %vm428_vm3, 16843009, %v841_v26  ;;  %v372_v29 = vand.u32 2147483647, %v370_v22  ;;  %v431_v30 = vunpack.c.0.s8 %v429_v27 }
  0x94   : > { %v432_v31 = vunpack.c.0.s8 %v430_v28  ;;  %v395_v32 = vmax.f32 %v1113_v3, %v393_v23 }
  0x95   : > { %400 = vrot.lane.b32.xlu1 %v394_v24, %s842_s26  ;;  %396 = vrot.lane.b32.xlu0 %v394_v24, %s843_s10  ;;  %v373_v33 = vadd.f32 %v372_v29, %v371_v25  ;;  %vm433_vm4 = vcmp.ne.s32.totalorder %v431_v30, 0 }
  0x96   : > { %vm434_vm5 = vcmp.ne.s32.totalorder %v432_v31, 0  ;;  %v435_v34 = vsel %vm433_vm4, %v359_v10, %v357_v4 }
  0x97   : > { %v436_v35 = vsel %vm434_vm5, %v360_v11, %v358_v9  ;;  %v374_v36 = vrot.slane %v373_v33, 4  ;;  %v437_v37 = vsub.f32 %v1111_v2, %v435_v34 }
  0x98   : > { %v438_v38 = vsub.f32 %v1113_v3, %v436_v35 }
  0x99   : > { %402 = vrot.lane.b32.xlu1 %v395_v32, %s842_s26  ;;  %398 = vrot.lane.b32.xlu0 %v395_v32, %s843_s10  ;;  %v375_v39 = vadd.f32 %v374_v36, %v373_v33  ;;  %v439_v40 = vand.u32 2147483647, %v437_v37 }
  0x9a   : > { %v440_v41 = vand.u32 2147483647, %v438_v38 }
  0x9b   : > { %v376_v42 = vrot.slane %v375_v39, 2 }
  0x9c   : > { %v441_v43 = vadd.f32 %v440_v41, %v439_v40 }
  0x9d   : > { %v377_v44 = vadd.f32 %v376_v42, %v375_v39 }
  0x9e   : > { %v442_v45 = vrot.slane %v441_v43, 4 }
  0x9f   : > { %v378_v46 = vrot.slane %v377_v44, 1 }
  0xa0   : > { %v443_v47 = vadd.f32 %v442_v45, %v441_v43 }
  0xa1   : > { %v379_v48 = vadd.f32 %v378_v46, %v377_v44 }
  0xa2   : > { %v444_v49 = vrot.slane %v443_v47, 2 }
  0xa3   : > { %448 = vst [vmem:[%s1140_s28] sm:$0x1] %v379_v48 }
  0xa4   : > { %v445_v50 = vadd.f32 %v444_v49, %v443_v47 }
  0xa6   : > { %v446_v51 = vrot.slane %v445_v50, 1 }
  0xa8   : > { %v447_v52 = vadd.f32 %v446_v51, %v445_v50 }
  0xaa   : > { %450 = vst [vmem:[%s1140_s28 + $0x2] sm:$0x1] %v447_v52 }
 0x107   : > { %v401_v53 = vpop.permute.xlu1 %400  ;;  %v397_v54 = vpop.permute.xlu0 %396 }
 0x108   : > { %v404_v55 = vmax.f32 %v397_v54, %v401_v53 }
 0x10a   : > { %v406_v56 = vmax.f32 %v404_v55, %v392_v19 }
 0x10b   : > { %v403_v57 = vpop.permute.xlu1 %402  ;;  %v399_v58 = vpop.permute.xlu0 %398 }
 0x10c   : > { %v408_v59 = vsub.f32 %v1111_v2, %v406_v56  ;;  %v405_v60 = vmax.f32 %v399_v58, %v403_v57 }
 0x10e   : > { %v410_v61 = vmax.f32 %v408_v59, 0.0  ;;  %v407_v62 = vmax.f32 %v405_v60, %v393_v23 }
 0x110   : > { %v412_v63 = vmul.f32 %v410_v61, %v1111_v2  ;;  %v409_v0 = vsub.f32 %v1113_v3, %v407_v62 }
 0x112   : > { %v411_v1 = vmax.f32 %v409_v0, 0.0  ;;  %v414_v4 = vand.u32 2147483647, %v412_v63 }
 0x114   : > { %v413_v5 = vmul.f32 %v411_v1, %v1113_v3  ;;  %v418_v9 = vmul.f32 %v414_v4, %v365_v6 }
 0x116   : > { %v415_v8 = vand.u32 2147483647, %v413_v5 }
 0x118   : > { %v419_v10 = vmul.f32 %v415_v8, %v366_v7 }
 0x11a   : > { %v420_v11 = vadd.f32 %v419_v10, %v418_v9 }
 0x11c   : > { %v421_v12 = vrot.slane %v420_v11, 4 }
 0x11e   : > { %v422_v13 = vadd.f32 %v421_v12, %v420_v11 }
 0x120   : > { %v423_v14 = vrot.slane %v422_v13, 2 }
 0x122   : > { %v424_v15 = vadd.f32 %v423_v14, %v422_v13 }
 0x124   : > { %v425_v16 = vrot.slane %v424_v15, 1 }
 0x126   : > { %v426_v17 = vadd.f32 %v425_v16, %v424_v15 }
 0x128   : > { %449 = vst [vmem:[%s1140_s28 + $0x1] sm:$0x1] %v426_v17 }
 0x129 PF: > { %p19_p3 = scmp.ge.s32.totalorder %s895_s22, 4   ;;  %s1192_s18 = smov %s825_s19 }
 0x12a   : > { %s1193_s19 = smov %s829_s20  ;;  %s1194_s20 = smov %s904_s25 }
 0x12b   : > { %s1195_s21 = smov %s895_s22  ;;  %21 = sbr.rel (!%p19_p3) target bundleno = 8 (0x8), region = 111 }
 0x132   :  { %470 = vsyncpa [#allocation3], 1 }
 0x133   :  { %472 = vsyncpa [#allocation3 + $0x1], 1 }
 0x134   :  { %473 = vsyncpa [#allocation5], 1 }
 0x135   :  { %475 = vsyncpa [#allocation5 + $0x1], 1 }
 0x136   :  { %476 = vsyncpa [#allocation8], 1 }

</bundles_post_ra>
